<compile_context>
chip_gen: v7x
topology: tpu7x:2x2x1
jax: 0.10.0
libtpu: 0.0.40
codegen_flags: <defaults>
</compile_context>

<pallas_src>
import functools
import math

import jax
import jax.numpy as jnp
from jax.experimental import pallas as pl
from jax.experimental.pallas import tpu as pltpu


# ------------------------------ Pallas kernel --------------------------------

def _homography_warp_kernel(hom_ref, grid_ref, img_ref, out_ref, *, H, W, C):
    """Warp one (batch, destination-pixel-tile) block.

    hom_ref : SMEM (B*9,) f32      row-major 3x3 homographies, flat
    grid_ref: VMEM (2, TP) f32     normalized dst coords (row 0 = x, row 1 = y)
    img_ref : VMEM (1, C*H, W)     source image (native dtype), rows = C*H
    out_ref : VMEM (1, C, TP)      one lane-dense tile of warped output pixels
    """
    TP = grid_ref.shape[1]
    b = pl.program_id(0)
    base = b * 9
    h00 = hom_ref[base + 0]; h01 = hom_ref[base + 1]; h02 = hom_ref[base + 2]
    h10 = hom_ref[base + 3]; h11 = hom_ref[base + 4]; h12 = hom_ref[base + 5]
    h20 = hom_ref[base + 6]; h21 = hom_ref[base + 7]; h22 = hom_ref[base + 8]

    g = grid_ref[...]                      # (2, TP)
    xn = g[0:1, :]                         # (1, TP) normalized dst x in [-1, 1]
    yn = g[1:2, :]                         # (1, TP) normalized dst y in [-1, 1]

    # Projective transform of the destination grid (tgm.transform_points).
    u = h00 * xn + h01 * yn + h02
    v = h10 * xn + h11 * yn + h12
    w = h20 * xn + h21 * yn + h22
    # TODO(synk): the |w| clamp flips the sign of tiny negative w; irrelevant
    # for the affine homographies generated here (w == 1) but differs from
    # torchgeometry for genuine perspective transforms.
    w = jnp.where(jnp.abs(w) < 1e-8, 1e-8, w)
    inv_w = pl.reciprocal(w, approx=True)  # EUP, off the VALU slot
    sx = u * inv_w
    sy = v * inv_w

    # Normalized -> source pixel coords (grid_sample, align_corners=True).
    ix = (sx + 1.0) * (0.5 * (W - 1))
    iy = (sy + 1.0) * (0.5 * (H - 1))
    x0f = jnp.floor(ix)
    y0f = jnp.floor(iy)
    fx = ix - x0f
    fy = iy - y0f
    x0 = x0f.astype(jnp.int32)
    y0 = y0f.astype(jnp.int32)

    # padding_mode='zeros': out-of-range taps contribute nothing.
    wx0 = jnp.where((x0 >= 0) & (x0 <= W - 1), 1.0 - fx, 0.0)        # (1, TP)
    wx1 = jnp.where((x0 >= -1) & (x0 <= W - 2), fx, 0.0)             # x1 = x0+1
    wy0 = jnp.where((y0 >= 0) & (y0 <= H - 1), 1.0 - fy, 0.0)
    wy1 = jnp.where((y0 >= -1) & (y0 <= H - 2), fy, 0.0)             # y1 = y0+1

    # Column (x) one-hot weights Cx: (W, TP), <= 2 non-zeros per column.
    xq = jax.lax.broadcasted_iota(jnp.int32, (W, TP), 0)
    dx = xq - x0
    cx = jnp.where(dx == 0, wx0, jnp.where(dx == 1, wx1, 0.0))        # (W, TP)

    # Row (y) weights R: (H, TP), <= 2 non-zeros per column.
    yq = jax.lax.broadcasted_iota(jnp.int32, (H, TP), 0)
    dy = yq - y0
    r = jnp.where(dy == 0, wy0, jnp.where(dy == 1, wy1, 0.0))         # (H, TP)

    # Separable sampling: x-contraction on the MXU (bf16 operands, f32 acc),
    # y-contraction as an elementwise multiply + sublane reduce.
    img = img_ref[0].astype(jnp.bfloat16)                             # (C*H, W)
    t = jnp.dot(img, cx.astype(jnp.bfloat16),
                preferred_element_type=jnp.float32)                   # (C*H, TP)
    t = t.reshape(C, H, TP)
    out = jnp.sum(t * r[None, :, :], axis=1)                          # (C, TP)
    out_ref[0] = out.astype(out_ref.dtype)


# ------------------------------ tiling / VMEM ---------------------------------

def _choose_tile(B, C, H, W, HW, img_dtype):
    """Pick a 128-multiple destination-pixel tile and a VMEM limit that fit the
    current TPU generation (v7x: 64 MiB physical; v5e default scoped: 16 MiB)."""
    try:
        info = pltpu.get_tpu_info()
        vmem_cap = int(getattr(info, "vmem_capacity_bytes", 64 << 20))
    except Exception:
        vmem_cap = 64 << 20                     # conservative (v7x) fallback
    budget = int(vmem_cap * 0.7)                # headroom for pipelining bufs

    img_bytes = jnp.dtype(img_dtype).itemsize
    # Resident, tile-size-independent: double-buffered img block + bf16 copy.
    fixed = 2 * C * H * W * img_bytes + C * H * W * 2
    # Per-destination-lane temporaries (bytes): Cx (+bf16 copy), R, iotas,
    # the (C*H, TP) partial product, its (C, H, TP) copy, a few (1, TP) vectors.
    per_lane = 4 * int(2.5 * W + 3 * H + 2.5 * C * H + 2 * C + 40)

    tp = (max(budget - fixed, per_lane * 128) // per_lane) // 128 * 128
    tp = int(max(128, min(2048, tp)))
    hw_ceil = -(-HW // 128) * 128
    tp = min(tp, hw_ceil)
    # v7x has 2 TensorCores: keep >= 2 parallel grid steps even for B == 1.
    if B == 1 and hw_ceil // tp < 2 and hw_ceil >= 256:
        tp = max(128, (tp // 2) // 128 * 128)
    hw_pad = -(-HW // tp) * tp

    est = fixed + per_lane * tp + 2 * (2 * tp * 4 + C * tp * img_bytes)
    vmem_limit = int(min(vmem_cap, max(32 << 20, 2 * est)))
    return tp, hw_pad, vmem_limit


# ------------------------------ Pallas wrapper --------------------------------

def pallas_homography_warp(x, homography):
    """tgm.HomographyWarper(H, W)(x, homography): bilinear homography warp in
    normalized [-1, 1] coordinates, zeros padding, align_corners=True."""
    B, C, H, W = x.shape
    HW = H * W
    TP, hw_pad, vmem_limit = _choose_tile(B, C, H, W, HW, x.dtype)

    # Normalized destination meshgrid (HomographyWarper caches this in
    # __init__); row 0 = x, row 1 = y, flattened row-major (padded to hw_pad).
    xs = jnp.arange(W, dtype=jnp.float32) * (2.0 / max(W - 1, 1)) - 1.0
    ys = jnp.arange(H, dtype=jnp.float32) * (2.0 / max(H - 1, 1)) - 1.0
    gx = jnp.broadcast_to(xs[None, :], (H, W)).reshape(1, HW)
    gy = jnp.broadcast_to(ys[:, None], (H, W)).reshape(1, HW)
    grid_xy = jnp.concatenate([gx, gy], axis=0)                      # (2, HW)
    if hw_pad != HW:
        grid_xy = jnp.pad(grid_xy, ((0, 0), (0, hw_pad - HW)))

    img = x.reshape(B, C * H, W)                 # native dtype, no upcast
    hom = homography.reshape(B * 9).astype(jnp.float32)

    kernel = functools.partial(_homography_warp_kernel, H=H, W=W, C=C)
    out = pl.pallas_call(
        kernel,
        out_shape=jax.ShapeDtypeStruct((B, C, hw_pad), x.dtype),
        grid=(B, hw_pad // TP),
        in_specs=[
            pl.BlockSpec(memory_space=pltpu.MemorySpace.SMEM),       # (B*9,)
            pl.BlockSpec((2, TP), lambda b, t: (0, t)),              # dst grid
            pl.BlockSpec((1, C * H, W), lambda b, t: (b, 0, 0)),     # source img
        ],
        out_specs=pl.BlockSpec((1, C, TP), lambda b, t: (b, 0, t)),
        compiler_params=pltpu.CompilerParams(
            dimension_semantics=("parallel", "parallel"),
            vmem_limit_bytes=vmem_limit),
    )(hom, grid_xy, img)
    return out[:, :, :HW].reshape(B, C, H, W)


# ------------------------------ forward pass ----------------------------------

def augmentation_forward(x, key, scale_range=(0.7, 1.1),
                         rot_range=(-math.pi / 3, math.pi / 3)):
    """AugmentationModule.forward: sample per-batch angle / scale / flip, build
    the 3x3 homography, warp x with it, return (warped, homography)."""
    # TODO(synk): the PyTorch module mutates persistent buffers in place with
    # torch RNG; this forward is functional and draws fresh parameters from
    # `key` (same distributions, different random stream).
    B = x.shape[0]
    ka, ks, kf = jax.random.split(key, 3)
    angles = jax.random.uniform(ka, (B,), jnp.float32,
                                minval=rot_range[0], maxval=rot_range[1])
    scales = jax.random.uniform(ks, (B,), jnp.float32,
                                minval=scale_range[0], maxval=scale_range[1])
    flips = jax.random.bernoulli(kf, 0.5, (B,)).astype(jnp.float32)

    sgn = 2.0 * flips - 1.0
    ca = jnp.cos(angles)
    sa = jnp.sin(angles)
    zeros = jnp.zeros((B,), jnp.float32)
    ones = jnp.ones((B,), jnp.float32)
    # 3x3 construction is B*9 scalars of trig/mul -- kept as JAX glue; the warp
    # hot path runs in the Pallas kernel.
    homography = jnp.stack([
        -sgn * scales * ca, sgn * scales * sa, zeros,
        scales * sa,        scales * ca,       zeros,
        zeros,              zeros,             ones,
    ], axis=-1).reshape(B, 3, 3)

    output = pallas_homography_warp(x, homography)
    return output, homography


# --------------------------- pure-JAX reference --------------------------------

def _homography_warp_ref(x, homography):
    """Gather-based f32 reference of the same warp semantics (validation)."""
    B, C, H, W = x.shape
    HW = H * W
    xs = jnp.arange(W, dtype=jnp.float32) * (2.0 / max(W - 1, 1)) - 1.0
    ys = jnp.arange(H, dtype=jnp.float32) * (2.0 / max(H - 1, 1)) - 1.0
    gx = jnp.broadcast_to(xs[None, :], (H, W)).reshape(HW)
    gy = jnp.broadcast_to(ys[:, None], (H, W)).reshape(HW)

    h = homography
    u = h[:, 0, 0:1] * gx[None, :] + h[:, 0, 1:2] * gy[None, :] + h[:, 0, 2:3]
    v = h[:, 1, 0:1] * gx[None, :] + h[:, 1, 1:2] * gy[None, :] + h[:, 1, 2:3]
    w = h[:, 2, 0:1] * gx[None, :] + h[:, 2, 1:2] * gy[None, :] + h[:, 2, 2:3]
    w = jnp.where(jnp.abs(w) < 1e-8, 1e-8, w)
    sx = u / w
    sy = v / w

    ix = (sx + 1.0) * (0.5 * (W - 1))
    iy = (sy + 1.0) * (0.5 * (H - 1))
    x0f = jnp.floor(ix)
    y0f = jnp.floor(iy)
    fx = ix - x0f
    fy = iy - y0f
    x0 = x0f.astype(jnp.int32)
    y0 = y0f.astype(jnp.int32)
    x1 = x0 + 1
    y1 = y0 + 1

    flat = x.reshape(B, C, HW).astype(jnp.float32)

    def tap(yt, xt, wt):
        ok = (xt >= 0) & (xt <= W - 1) & (yt >= 0) & (yt <= H - 1)
        wt = jnp.where(ok, wt, 0.0)                                   # (B, HW)
        idx = jnp.clip(yt, 0, H - 1) * W + jnp.clip(xt, 0, W - 1)     # (B, HW)
        gathered = jnp.take_along_axis(
            flat, jnp.broadcast_to(idx[:, None, :], (B, C, HW)), axis=2)
        return gathered * wt[:, None, :]

    out = (tap(y0, x0, (1.0 - fy) * (1.0 - fx)) + tap(y0, x1, (1.0 - fy) * fx)
           + tap(y1, x0, fy * (1.0 - fx)) + tap(y1, x1, fy * fx))
    return out.reshape(B, C, H, W)


# ------------------------------------ main -------------------------------------

if __name__ == "__main__":
    root = jax.random.PRNGKey(0)
    kx, kaug = jax.random.split(root)

    B, C, H, W = 2, 4, 16, 16
    x = jax.random.normal(kx, (B, C, H, W), jnp.float32)

    fwd = jax.jit(augmentation_forward)
    out, hom = fwd(x, kaug)
    jax.block_until_ready((out, hom))

    assert out.shape == (B, C, H, W), out.shape
    assert out.dtype == x.dtype, out.dtype
    assert hom.shape == (B, 3, 3), hom.shape

    ref = _homography_warp_ref(x, hom)
    # Tolerance covers the bf16 MXU operands + approx reciprocal (both << 5e-2).
    err = float(jnp.max(jnp.abs(out.astype(jnp.float32) - ref)))
    assert err < 5e-2, f"max abs err vs reference: {err}"
    print("KERNEL_OK")
</pallas_src>

<mosaic_0001>
module attributes {stable_mosaic.version = 11 : i64} {
  func.func @_homography_warp_kernel(%arg0: i32, %arg1: i32, %arg2: memref<18xf32, #tpu.memory_space<smem>>, %arg3: memref<2x256xf32, #tpu.memory_space<vmem>>, %arg4: memref<1x64x16xf32, #tpu.memory_space<vmem>>, %arg5: memref<1x4x256xf32, #tpu.memory_space<vmem>>) attributes {dimension_semantics = [#tpu.dimension_semantics<parallel>, #tpu.dimension_semantics<parallel>], iteration_bounds = array<i64: 2, 1>, scalar_prefetch = 0 : i64, scratch_operands = 0 : i64, tpu.core_type = #tpu.core_type<tc>, window_params = [{transform_indices = @transform_0, window_bounds = array<i64: 18>}, {transform_indices = @transform_1, window_bounds = array<i64: 2, 256>}, {transform_indices = @transform_2, window_bounds = array<i64: 1, 64, 16>}, {transform_indices = @transform_3, window_bounds = array<i64: 1, 4, 256>}]} {
    %c9_i32 = arith.constant 9 : i32
    %0 = arith.muli %arg0, %c9_i32 : i32
    %c0_i32 = arith.constant 0 : i32
    %1 = arith.addi %0, %c0_i32 : i32
    %2 = arith.index_cast %1 : i32 to index
    %3 = memref.load %arg2[%2] : memref<18xf32, #tpu.memory_space<smem>>
    %c1_i32 = arith.constant 1 : i32
    %4 = arith.addi %0, %c1_i32 : i32
    %5 = arith.index_cast %4 : i32 to index
    %6 = memref.load %arg2[%5] : memref<18xf32, #tpu.memory_space<smem>>
    %c2_i32 = arith.constant 2 : i32
    %7 = arith.addi %0, %c2_i32 : i32
    %8 = arith.index_cast %7 : i32 to index
    %9 = memref.load %arg2[%8] : memref<18xf32, #tpu.memory_space<smem>>
    %c3_i32 = arith.constant 3 : i32
    %10 = arith.addi %0, %c3_i32 : i32
    %11 = arith.index_cast %10 : i32 to index
    %12 = memref.load %arg2[%11] : memref<18xf32, #tpu.memory_space<smem>>
    %c4_i32 = arith.constant 4 : i32
    %13 = arith.addi %0, %c4_i32 : i32
    %14 = arith.index_cast %13 : i32 to index
    %15 = memref.load %arg2[%14] : memref<18xf32, #tpu.memory_space<smem>>
    %c5_i32 = arith.constant 5 : i32
    %16 = arith.addi %0, %c5_i32 : i32
    %17 = arith.index_cast %16 : i32 to index
    %18 = memref.load %arg2[%17] : memref<18xf32, #tpu.memory_space<smem>>
    %c6_i32 = arith.constant 6 : i32
    %19 = arith.addi %0, %c6_i32 : i32
    %20 = arith.index_cast %19 : i32 to index
    %21 = memref.load %arg2[%20] : memref<18xf32, #tpu.memory_space<smem>>
    %c7_i32 = arith.constant 7 : i32
    %22 = arith.addi %0, %c7_i32 : i32
    %23 = arith.index_cast %22 : i32 to index
    %24 = memref.load %arg2[%23] : memref<18xf32, #tpu.memory_space<smem>>
    %c8_i32 = arith.constant 8 : i32
    %25 = arith.addi %0, %c8_i32 : i32
    %26 = arith.index_cast %25 : i32 to index
    %27 = memref.load %arg2[%26] : memref<18xf32, #tpu.memory_space<smem>>
    %c0 = arith.constant 0 : index
    %c0_0 = arith.constant 0 : index
    %28 = vector.load %arg3[%c0, %c0_0] : memref<2x256xf32, #tpu.memory_space<vmem>>, vector<2x256xf32>
    %29 = vector.extract_strided_slice %28 {offsets = [0, 0], sizes = [1, 256], strides = [1, 1]} : vector<2x256xf32> to vector<1x256xf32>
    %30 = vector.extract_strided_slice %28 {offsets = [1, 0], sizes = [1, 256], strides = [1, 1]} : vector<2x256xf32> to vector<1x256xf32>
    %31 = vector.broadcast %3 : f32 to vector<1x256xf32>
    %32 = arith.mulf %31, %29 : vector<1x256xf32>
    %33 = vector.broadcast %6 : f32 to vector<1x256xf32>
    %34 = arith.mulf %33, %30 : vector<1x256xf32>
    %35 = arith.addf %32, %34 : vector<1x256xf32>
    %36 = vector.broadcast %9 : f32 to vector<1x256xf32>
    %37 = arith.addf %35, %36 : vector<1x256xf32>
    %38 = vector.broadcast %12 : f32 to vector<1x256xf32>
    %39 = arith.mulf %38, %29 : vector<1x256xf32>
    %40 = vector.broadcast %15 : f32 to vector<1x256xf32>
    %41 = arith.mulf %40, %30 : vector<1x256xf32>
    %42 = arith.addf %39, %41 : vector<1x256xf32>
    %43 = vector.broadcast %18 : f32 to vector<1x256xf32>
    %44 = arith.addf %42, %43 : vector<1x256xf32>
    %45 = vector.broadcast %21 : f32 to vector<1x256xf32>
    %46 = arith.mulf %45, %29 : vector<1x256xf32>
    %47 = vector.broadcast %24 : f32 to vector<1x256xf32>
    %48 = arith.mulf %47, %30 : vector<1x256xf32>
    %49 = arith.addf %46, %48 : vector<1x256xf32>
    %50 = vector.broadcast %27 : f32 to vector<1x256xf32>
    %51 = arith.addf %49, %50 : vector<1x256xf32>
    %52 = math.absf %51 : vector<1x256xf32>
    %cst = arith.constant 9.99999993E-9 : f32
    %53 = vector.broadcast %cst : f32 to vector<1x256xf32>
    %54 = arith.cmpf olt, %52, %53 : vector<1x256xf32>
    %cst_1 = arith.constant 9.99999993E-9 : f32
    %55 = vector.broadcast %cst_1 : f32 to vector<1x256xf32>
    %56 = arith.select %54, %55, %51 : vector<1x256xi1>, vector<1x256xf32>
    %57 = tpu.reciprocal %56 {approx = true} : vector<1x256xf32> -> vector<1x256xf32>
    %58 = arith.mulf %37, %57 : vector<1x256xf32>
    %59 = arith.mulf %44, %57 : vector<1x256xf32>
    %cst_2 = arith.constant 1.000000e+00 : f32
    %60 = vector.broadcast %cst_2 : f32 to vector<1x256xf32>
    %61 = arith.addf %58, %60 : vector<1x256xf32>
    %cst_3 = arith.constant 7.500000e+00 : f32
    %62 = vector.broadcast %cst_3 : f32 to vector<1x256xf32>
    %63 = arith.mulf %61, %62 : vector<1x256xf32>
    %cst_4 = arith.constant 1.000000e+00 : f32
    %64 = vector.broadcast %cst_4 : f32 to vector<1x256xf32>
    %65 = arith.addf %59, %64 : vector<1x256xf32>
    %cst_5 = arith.constant 7.500000e+00 : f32
    %66 = vector.broadcast %cst_5 : f32 to vector<1x256xf32>
    %67 = arith.mulf %65, %66 : vector<1x256xf32>
    %68 = math.floor %63 : vector<1x256xf32>
    %69 = math.floor %67 : vector<1x256xf32>
    %70 = arith.subf %63, %68 : vector<1x256xf32>
    %71 = arith.subf %67, %69 : vector<1x256xf32>
    %72 = arith.fptosi %68 : vector<1x256xf32> to vector<1x256xi32>
    %73 = arith.fptosi %69 : vector<1x256xf32> to vector<1x256xi32>
    %c0_i32_6 = arith.constant 0 : i32
    %74 = vector.broadcast %c0_i32_6 : i32 to vector<1x256xi32>
    %75 = arith.cmpi sge, %72, %74 : vector<1x256xi32>
    %c15_i32 = arith.constant 15 : i32
    %76 = vector.broadcast %c15_i32 : i32 to vector<1x256xi32>
    %77 = arith.cmpi sle, %72, %76 : vector<1x256xi32>
    %78 = arith.andi %75, %77 : vector<1x256xi1>
    %cst_7 = arith.constant 1.000000e+00 : f32
    %79 = vector.broadcast %cst_7 : f32 to vector<1x256xf32>
    %80 = arith.subf %79, %70 : vector<1x256xf32>
    %cst_8 = arith.constant 0.000000e+00 : f32
    %81 = vector.broadcast %cst_8 : f32 to vector<1x256xf32>
    %82 = arith.select %78, %80, %81 : vector<1x256xi1>, vector<1x256xf32>
    %c-1_i32 = arith.constant -1 : i32
    %83 = vector.broadcast %c-1_i32 : i32 to vector<1x256xi32>
    %84 = arith.cmpi sge, %72, %83 : vector<1x256xi32>
    %c14_i32 = arith.constant 14 : i32
    %85 = vector.broadcast %c14_i32 : i32 to vector<1x256xi32>
    %86 = arith.cmpi sle, %72, %85 : vector<1x256xi32>
    %87 = arith.andi %84, %86 : vector<1x256xi1>
    %cst_9 = arith.constant 0.000000e+00 : f32
    %88 = vector.broadcast %cst_9 : f32 to vector<1x256xf32>
    %89 = arith.select %87, %70, %88 : vector<1x256xi1>, vector<1x256xf32>
    %c0_i32_10 = arith.constant 0 : i32
    %90 = vector.broadcast %c0_i32_10 : i32 to vector<1x256xi32>
    %91 = arith.cmpi sge, %73, %90 : vector<1x256xi32>
    %c15_i32_11 = arith.constant 15 : i32
    %92 = vector.broadcast %c15_i32_11 : i32 to vector<1x256xi32>
    %93 = arith.cmpi sle, %73, %92 : vector<1x256xi32>
    %94 = arith.andi %91, %93 : vector<1x256xi1>
    %cst_12 = arith.constant 1.000000e+00 : f32
    %95 = vector.broadcast %cst_12 : f32 to vector<1x256xf32>
    %96 = arith.subf %95, %71 : vector<1x256xf32>
    %cst_13 = arith.constant 0.000000e+00 : f32
    %97 = vector.broadcast %cst_13 : f32 to vector<1x256xf32>
    %98 = arith.select %94, %96, %97 : vector<1x256xi1>, vector<1x256xf32>
    %c-1_i32_14 = arith.constant -1 : i32
    %99 = vector.broadcast %c-1_i32_14 : i32 to vector<1x256xi32>
    %100 = arith.cmpi sge, %73, %99 : vector<1x256xi32>
    %c14_i32_15 = arith.constant 14 : i32
    %101 = vector.broadcast %c14_i32_15 : i32 to vector<1x256xi32>
    %102 = arith.cmpi sle, %73, %101 : vector<1x256xi32>
    %103 = arith.andi %100, %102 : vector<1x256xi1>
    %cst_16 = arith.constant 0.000000e+00 : f32
    %104 = vector.broadcast %cst_16 : f32 to vector<1x256xf32>
    %105 = arith.select %103, %71, %104 : vector<1x256xi1>, vector<1x256xf32>
    %106 = tpu.iota {dimensions = array<i32: 0>} : vector<16x256xi32>
    %107 = vector.broadcast %72 : vector<1x256xi32> to vector<16x256xi32>
    %108 = arith.subi %106, %107 : vector<16x256xi32>
    %c0_i32_17 = arith.constant 0 : i32
    %109 = vector.broadcast %c0_i32_17 : i32 to vector<16x256xi32>
    %110 = arith.cmpi eq, %108, %109 : vector<16x256xi32>
    %c1_i32_18 = arith.constant 1 : i32
    %111 = vector.broadcast %c1_i32_18 : i32 to vector<16x256xi32>
    %112 = arith.cmpi eq, %108, %111 : vector<16x256xi32>
    %cst_19 = arith.constant 0.000000e+00 : f32
    %113 = vector.shape_cast %89 : vector<1x256xf32> to vector<1x256xf32>
    %114 = vector.broadcast %113 : vector<1x256xf32> to vector<16x256xf32>
    %115 = vector.broadcast %cst_19 : f32 to vector<16x256xf32>
    %116 = arith.select %112, %114, %115 : vector<16x256xi1>, vector<16x256xf32>
    %117 = vector.shape_cast %82 : vector<1x256xf32> to vector<1x256xf32>
    %118 = vector.broadcast %117 : vector<1x256xf32> to vector<16x256xf32>
    %119 = arith.select %110, %118, %116 : vector<16x256xi1>, vector<16x256xf32>
    %120 = tpu.iota {dimensions = array<i32: 0>} : vector<16x256xi32>
    %121 = vector.broadcast %73 : vector<1x256xi32> to vector<16x256xi32>
    %122 = arith.subi %120, %121 : vector<16x256xi32>
    %c0_i32_20 = arith.constant 0 : i32
    %123 = vector.broadcast %c0_i32_20 : i32 to vector<16x256xi32>
    %124 = arith.cmpi eq, %122, %123 : vector<16x256xi32>
    %c1_i32_21 = arith.constant 1 : i32
    %125 = vector.broadcast %c1_i32_21 : i32 to vector<16x256xi32>
    %126 = arith.cmpi eq, %122, %125 : vector<16x256xi32>
    %cst_22 = arith.constant 0.000000e+00 : f32
    %127 = vector.shape_cast %105 : vector<1x256xf32> to vector<1x256xf32>
    %128 = vector.broadcast %127 : vector<1x256xf32> to vector<16x256xf32>
    %129 = vector.broadcast %cst_22 : f32 to vector<16x256xf32>
    %130 = arith.select %126, %128, %129 : vector<16x256xi1>, vector<16x256xf32>
    %131 = vector.shape_cast %98 : vector<1x256xf32> to vector<1x256xf32>
    %132 = vector.broadcast %131 : vector<1x256xf32> to vector<16x256xf32>
    %133 = arith.select %124, %132, %130 : vector<16x256xi1>, vector<16x256xf32>
    %c0_23 = arith.constant 0 : index
    %c0_24 = arith.constant 0 : index
    %c0_25 = arith.constant 0 : index
    %134 = vector.load %arg4[%c0_23, %c0_24, %c0_25] : memref<1x64x16xf32, #tpu.memory_space<vmem>>, vector<1x64x16xf32>
    %135 = vector.shape_cast %134 : vector<1x64x16xf32> to vector<64x16xf32>
    %136 = arith.truncf %135 : vector<64x16xf32> to vector<64x16xbf16>
    %137 = arith.truncf %119 : vector<16x256xf32> to vector<16x256xbf16>
    %cst_26 = arith.constant dense<0.000000e+00> : vector<64x256xf32>
    %138 = tpu.matmul %136, %137, %cst_26 {dimension_numbers = #tpu.dot_dimension_numbers<[1], [0], [0], [1], [0, 0, 1, 1], [], []>} : vector<64x16xbf16>, vector<16x256xbf16>, vector<64x256xf32> -> vector<64x256xf32>
    %139 = vector.shape_cast %138 : vector<64x256xf32> to vector<4x16x256xf32>
    %140 = vector.shape_cast %133 : vector<16x256xf32> to vector<1x16x256xf32>
    %141 = vector.broadcast %140 : vector<1x16x256xf32> to vector<4x16x256xf32>
    %142 = arith.mulf %139, %141 : vector<4x16x256xf32>
    %cst_27 = arith.constant dense<0.000000e+00> : vector<4x256xf32>
    %143 = vector.multi_reduction <add>, %142, %cst_27 [1] : vector<4x16x256xf32> to vector<4x256xf32>
    %c0_28 = arith.constant 0 : index
    %c0_29 = arith.constant 0 : index
    %c0_30 = arith.constant 0 : index
    %144 = vector.load %arg5[%c0_28, %c0_29, %c0_30] : memref<1x4x256xf32, #tpu.memory_space<vmem>>, vector<1x4x256xf32>
    %145 = vector.shape_cast %144 : vector<1x4x256xf32> to vector<4x256xf32>
    %146 = vector.shape_cast %143 : vector<4x256xf32> to vector<1x4x256xf32>
    tpu.vector_store %arg5[%c0_28, %c0_29, %c0_30], %146 {strides = array<i32>} : memref<1x4x256xf32, #tpu.memory_space<vmem>>, vector<1x4x256xf32>,
    return
  }
  func.func @transform_0(%arg0: i32, %arg1: i32) -> i32 {
    %c0_i32 = arith.constant 0 : i32
    %c0_i32_0 = arith.constant 0 : i32
    return %c0_i32 : i32
  }
  func.func @transform_1(%arg0: i32, %arg1: i32) -> (i32, i32) {
    %c0_i32 = arith.constant 0 : i32
    %c0_i32_0 = arith.constant 0 : i32
    return %c0_i32, %arg1 : i32, i32
  }
  func.func @transform_2(%arg0: i32, %arg1: i32) -> (i32, i32, i32) {
    %c0_i32 = arith.constant 0 : i32
    %c0_i32_0 = arith.constant 0 : i32
    %c0_i32_1 = arith.constant 0 : i32
    return %arg0, %c0_i32, %c0_i32_0 : i32, i32, i32
  }
  func.func @transform_3(%arg0: i32, %arg1: i32) -> (i32, i32, i32) {
    %c0_i32 = arith.constant 0 : i32
    %c0_i32_0 = arith.constant 0 : i32
    return %arg0, %c0_i32, %arg1 : i32, i32, i32
  }
}

</mosaic_0001>

<bundles_post_ra>
// kernel: augmentation_forward.3
= control target key start
LH: loop header
LB: loop body
LE: loop exit
PB: predicated region body
PF: predicated region fallthrough
CT: control target
= control target key end

     0   :  { %8 = vsyncpa [#allocation3], 0  ;;  %s909_s12 = smov 0   ;;  %s911_s13 = smov 0   ;;  %s1047_s0 = inlined_call_operand.vmem [shape: f32[18], index: 0, kind: input, shape index: {}]   ;;  %s1048_s1 = inlined_call_operand.vmem [shape: f32[2,256], index: 1, kind: input, shape index: {}]   ;;  %s1049_s2 = inlined_call_operand.vmem [shape: f32[2,64,16], index: 2, kind: input, shape index: {}]   ;;  %s1050_s3 = inlined_call_operand.vmem [shape: f32[2,4,256], index: 3, kind: output, shape index: {}]  }
   0x1   :  { %s913_s14 = smov 0  }
   0x2 LB: > { %s777_s15 = sadd.s32 4294967295, %s885_s14   ;;  %s26_s16 = sadd.s32 1, %s881_s13  ;;  %s885_s14 = sphi %s913_s14, %s14_s14   ;;  %s881_s13 = sphi %s911_s13, %s1054_s13   ;;  %s877_s12 = sphi %s909_s12, %s1053_s12  }
   0x3   : > { %p28_p0 = scmp.ge.s32.totalorder %s26_s16, 2  ;;  %p779_p1 = scmp.ge.s32.totalorder %s885_s14, 1 }
   0x4   : > { %p132_p2 = scmp.lt.s32.totalorder %s885_s14, 3  ;;  %p934_p4 = scmp.eq.s32.totalorder %s777_s15, 0 }
   0x5   : > { %s1056_s16 = smov (%p28_p0, %s26_s16), 0  ;;  %s145_s21 = sshll.u32 %s1047_s0, 4  ;;  %s146_s21 = int_to_ptr.vmem [resolvable:$true] %s145_s21 }
   0x6   : > { %p930_p3 = pnand %p779_p1, %p132_p2  ;;  %s844_s22 = scalar_lea.vmem %s146_s21, 16 }
   0x7   : > { %p845_p7 = scmp.ne.s32.totalorder %s146_s21, %s844_s22  ;;  %p852_p11 = scmp.lt.s32.totalorder %s146_s21, %s146_s21 }
   0x8   : > { %p810_p5 = pneg %p930_p3  ;;  %p853_p12 = scmp.lt.s32.totalorder %s844_s22, %s844_s22 }
   0xa   : > { %p811_p6 = pnand %p934_p4, %p810_p5  ;;  %p854_p13 = por %p853_p12, %p852_p11 }
   0xc   : > { %p846_p8 = pneg %p811_p6 }
   0xe   : > { %p847_p9 = pnand %p846_p8, %p845_p7 }
  0x10   : > { %p848_p10 = pneg %p847_p9 }
  0x12   : > { %p855_p0 = pnand %p854_p13, %p848_p10 }
  0x14   : > { %858 = shalt.err (!%p855_p0)
}
  0x15   : > { %s887_s23 = smov [#allocation2]   ;;  %175 = sbr.rel (%p930_p3) target bundleno = 344 (0x158), region = 32 }
  0x16   : > { %813 = dma.vmem_to_smem (!%p811_p6), %s146_s21, 16, %s887_s23, [#allocation3]  }
  0x1c   : > { %872 = dma.done.wait (%p934_p4), [#allocation3], 16  }
  0x1d   : > { %874 = vsyncadd (%p934_p4), [#allocation3], 4294967280 }
  0x1e   : > { %181 = sfence }
  0x1f   : > { %s952_s24 = smul.u32 9, %s877_s12  ;;  %v888_v0 = vmov 0   ;;  %v249_v1 = vld [vmem:[%s1048_s1] sm:$0xf]  ;;  %v317_v31 = vlaneseq  ;;  %p215_p1 = scmp.lt.s32.totalorder %s877_s12, 1  ;;  %vm482_vm15 = vcmask 130048  }
  0x20   : > { %527 = vmatprep.mubr.bf16.mxu0 %v888_v0  ;;  %547 = vmatprep.mubr.bf16.mxu1 %v888_v0 }
  0x21   : > { %s233_s25 = sadd.s32 1, %s952_s24  ;;  %s243_s26 = sadd.s32 6, %s952_s24  ;;  %v970_v34 = vshrl.u32 %v317_v31, 7 }
  0x22   : > { %s244_s27 = sld [smem:[#allocation2 + %s243_s26]]  ;;  %s245_s28 = sadd.s32 7, %s952_s24 }
  0x23   : > { %s246_s29 = sld [smem:[#allocation2 + %s245_s28]]  ;;  %s247_s30 = sadd.s32 8, %s952_s24  ;;  %v974_v38 = vsub.s32 0, %v970_v34  ;;  %v977_v39 = vsub.s32 2, %v970_v34  ;;  %v983_v42 = vadd.s32 8, %v970_v34 }
  0x24   : > { %s237_s4 = sadd.s32 3, %s952_s24  ;;  %s234_s5 = sld [smem:[#allocation2 + %s233_s25]] }
  0x25   : > { %s248_s6 = sld [smem:[#allocation2 + %s247_s30]]  ;;  %s239_s8 = sadd.s32 4, %s952_s24 }
  0x26   : > { %s238_s7 = sld [smem:[#allocation2 + %s237_s4]]  ;;  %s241_s15 = sadd.s32 5, %s952_s24 }
  0x27   : > { %s240_s11 = sld [smem:[#allocation2 + %s239_s8]]  ;;  %s235_s19 = sadd.s32 2, %s952_s24 }
  0x28   : > { %v272_v2 = vstv %s244_s27  ;;  %s242_s17 = sld [smem:[#allocation2 + %s241_s15]]  ;;  %s1058_s12 = smov (!%p215_p1, %s877_s12), 1 }
  0x29   : > { %v274_v3 = vstv %s246_s29  ;;  %s232_s18 = sld [smem:[#allocation2 + %s952_s24]]  ;;  %v273_v4 = vmul.f32 %v272_v2, %v249_v1  ;;  %s798_s21 = sshll.u32 %s1058_s12, 6 }
  0x2a   : > { %v275_v5 = vmul.f32 %v274_v3, %v249_v1  ;;  %v252_v11 = vstv %s234_s5  ;;  %s236_s20 = sld [smem:[#allocation2 + %s235_s19]]  ;;  %s1005_s24 = scalar_lea.vmem %s1049_s2, %s798_s21 }
  0x2b   : > { %v281_v8 = vstv %s248_s6  ;;  %v253_v16 = vmul.f32 %v252_v11, %v249_v1  ;;  %v468_v2 = vld [vmem:[%s1005_s24] sm:$0xff]  ;;  %s799_s25 = sshll.u32 %s1058_s12, 3 }
  0x2c   : > { %v791_v6 = vrot.slane %v275_v5, 9  ;;  %v261_v7 = vstv %s238_s7  ;;  %s228_s28 = scalar_lea.vmem %s1050_s3, %s799_s25 }
  0x2d   : > { %v262_v9 = vmul.f32 %v261_v7, %v249_v1  ;;  %v263_v10 = vstv %s240_s11  ;;  %v789_v23 = vrot.slane %v253_v16, 9  ;;  %v472_v7 = vld [vmem:[%s1005_s24 + $0x20] sm:$0xff]  ;;  %v474_v16 = vld [vmem:[%s1005_s24 + $0x30] sm:$0xff] }
  0x2e   : > { %v280_v12 = vadd.f32 %v791_v6, %v273_v4  ;;  %v264_v13 = vmul.f32 %v263_v10, %v249_v1  ;;  %v270_v17 = vstv %s242_s17  ;;  %v469_v6 = vld [vmem:[%s1005_s24 + $0x8] sm:$0xff] }
  0x2f   : > { %v250_v18 = vstv %s232_s18 }
  0x30   : > { %v282_v14 = vadd.f32 %v281_v8, %v280_v12  ;;  %v790_v15 = vrot.slane %v264_v13, 9  ;;  %v251_v22 = vmul.f32 %v250_v18, %v249_v1  ;;  %v259_v26 = vstv %s236_s20  ;;  %v473_v8 = vld [vmem:[%s1005_s24 + $0x28] sm:$0xff] }
  0x31   : > { %v476_v12 = vpack.c.bf16 %v469_v6, %v468_v2  ;;  %v478_v13 = vpack.c.bf16 %v473_v8, %v472_v7 }
  0x32   : > { %v283_v19 = vand.u32 2147483647, %v282_v14  ;;  %v269_v20 = vadd.f32 %v790_v15, %v262_v9  ;;  %v258_v25 = vadd.f32 %v789_v23, %v251_v22  ;;  %v471_v15 = vld [vmem:[%s1005_s24 + $0x18] sm:$0xff] }
  0x34   : > { %vm284_vm0 = vcmp.lt.f32.partialorder %v283_v19, 1e-08  ;;  %v271_v21 = vadd.f32 %v270_v17, %v269_v20  ;;  %v260_v27 = vadd.f32 %v259_v26, %v258_v25  ;;  %v475_v17 = vld [vmem:[%s1005_s24 + $0x38] sm:$0xff] }
  0x35   : > { %v285_v24 = vsel %vm284_vm0, 1e-08, %v282_v14  ;;  %v470_v14 = vld [vmem:[%s1005_s24 + $0x10] sm:$0xff]  ;;  %v479_v19 = vpack.c.bf16 %v475_v17, %v474_v16 }
  0x36   : > { %842 = vrcp.f32 %v285_v24  ;;  %v477_v18 = vpack.c.bf16 %v471_v15, %v470_v14 }
  0x40   : > { %v843_v28 = vpop.eup %842 }
  0x41   : > { %v287_v29 = vmul.f32 %v843_v28, %v260_v27  ;;  %v968_v30 = vmul.f32 %v843_v28, %v271_v21 }
  0x43   : > { %v289_v32 = vadd.f32 1.0, %v287_v29  ;;  %v291_v20 = vadd.f32 1.0, %v968_v30 }
  0x45   : > { %v290_v33 = vmul.f32 7.5, %v289_v32  ;;  %v292_v21 = vmul.f32 7.5, %v291_v20 }
  0x47   : > { %v293_v35 = vfloor.f32 %v290_v33  ;;  %v294_v22 = vfloor.f32 %v292_v21 }
  0x49   : > { %v295_v36 = vsub.f32 %v290_v33, %v293_v35  ;;  %v802_v37 = vtrunc.f32 %v293_v35  ;;  %v804_v23 = vtrunc.f32 %v294_v22  ;;  %v296_v25 = vsub.f32 %v292_v21, %v294_v22 }
  0x4b   : > { %v803_v40 = vcvt.f32.s32 %v802_v37  ;;  %v302_v41 = vsub.f32 1.0, %v295_v36  ;;  %v805_v24 = vcvt.f32.s32 %v804_v23  ;;  %v311_v27 = vsub.f32 1.0, %v296_v25 }
  0x4d   : > { %vm299_vm1 = vcmp.ge.s32.totalorder %v803_v40, 0  ;;  %vm300_vm2 = vcmp.le.s32.totalorder %v803_v40, 15  ;;  %vm304_vm3 = vcmp.ge.s32.totalorder %v803_v40, 4294967295  ;;  %vm305_vm4 = vcmp.le.s32.totalorder %v803_v40, 14 }
  0x4e   : > { %vm301_vm5 = vmand %vm299_vm1, %vm300_vm2  ;;  %v327_v43 = vrot.slane %v803_v40, %v977_v39  ;;  %v323_v44 = vrot.slane %v803_v40, %v974_v38  ;;  %vm313_vm0 = vcmp.ge.s32.totalorder %v805_v24, 4294967295  ;;  %vm314_vm1 = vcmp.le.s32.totalorder %v805_v24, 14 }
  0x4f   : > { %v303_v45 = vsel %vm301_vm5, %v302_v41, 0.0  ;;  %vm306_vm6 = vmand %vm304_vm3, %vm305_vm4  ;;  %v397_v26 = vrot.slane %v805_v24, %v974_v38  ;;  %vm308_vm2 = vcmp.ge.s32.totalorder %v805_v24, 0  ;;  %vm309_vm3 = vcmp.le.s32.totalorder %v805_v24, 15 }
  0x50   : > { %v307_v46 = vsel %vm306_vm6, %v295_v36, 0.0  ;;  %v335_v47 = vrot.slane %v327_v43, %v974_v38  ;;  %v379_v48 = vrot.slane %v303_v45, %v977_v39  ;;  %v331_v49 = vrot.slane %v323_v44, %v974_v38  ;;  %vm315_vm4 = vmand %vm313_vm0, %vm314_vm1 }
  0x51   : > { %v356_v50 = vrot.slane %v307_v46, %v977_v39  ;;  %v352_v51 = vrot.slane %v307_v46, %v974_v38  ;;  %v375_v52 = vrot.slane %v303_v45, %v974_v38  ;;  %vm310_vm5 = vmand %vm308_vm2, %vm309_vm3  ;;  %v316_v28 = vsel %vm315_vm4, %v296_v25, 0.0 }
  0x52   : > { %v337_v53 = vsub.s32 %v970_v34, %v335_v47  ;;  %v339_v54 = vsub.s32 %v983_v42, %v335_v47  ;;  %v389_v55 = vrot.slane %v379_v48, %v974_v38  ;;  %v336_v56 = vsub.s32 %v970_v34, %v331_v49 }
  0x53   : > { %v366_v57 = vrot.slane %v356_v50, %v974_v38  ;;  %v338_v58 = vsub.s32 %v983_v42, %v331_v49  ;;  %v362_v59 = vrot.slane %v352_v51, %v974_v38  ;;  %v385_v60 = vrot.slane %v375_v52, %v974_v38 }
  0x54   : > { %vm341_vm7 = vcmp.eq.s32.totalorder %v337_v53, 0  ;;  %vm343_vm8 = vcmp.eq.s32.totalorder %v339_v54, 0  ;;  %vm345_vm9 = vcmp.eq.s32.totalorder %v337_v53, 1  ;;  %vm347_vm10 = vcmp.eq.s32.totalorder %v339_v54, 1 }
  0x55   : > { %v368_v61 = vsel %vm345_vm9, %v366_v57, 0.0  ;;  %v370_v62 = vsel %vm347_vm10, %v366_v57, 0.0  ;;  %vm340_vm11 = vcmp.eq.s32.totalorder %v336_v56, 0  ;;  %vm342_vm12 = vcmp.eq.s32.totalorder %v338_v58, 0 }
  0x56   : > { %v391_v63 = vsel %vm341_vm7, %v389_v55, %v368_v61  ;;  %v393_v1 = vsel %vm343_vm8, %v389_v55, %v370_v62  ;;  %vm344_vm13 = vcmp.eq.s32.totalorder %v336_v56, 1  ;;  %vm346_vm14 = vcmp.eq.s32.totalorder %v338_v58, 1 }
  0x57   : > { %v481_v3 = vpack.c.bf16 %v393_v1, %v391_v63  ;;  %v367_v4 = vsel %vm344_vm13, %v362_v59, 0.0  ;;  %v369_v5 = vsel %vm346_vm14, %v362_v59, 0.0  ;;  %v405_v29 = vrot.slane %v397_v26, %v974_v38 }
  0x58   : > { %v390_v9 = vsel %vm340_vm11, %v385_v60, %v367_v4  ;;  %v392_v10 = vsel %vm342_vm12, %v385_v60, %v369_v5  ;;  %v312_v31 = vsel %vm310_vm5, %v311_v27, 0.0  ;;  %v426_v32 = vrot.slane %v316_v28, %v974_v38 }
  0x59   : > { %495 = vmatprep.subr.bf16.mxu0 %v481_v3  ;;  %800 = vmatprep.subr.bf16.mxu1 %v481_v3  ;;  %v480_v11 = vpack.c.bf16 %v392_v10, %v390_v9  ;;  %v410_v33 = vsub.s32 %v970_v34, %v405_v29  ;;  %v430_v35 = vrot.slane %v316_v28, %v977_v39  ;;  %vm653_vm14 = vcmask 1041409  }
  0x5a   : > { %v449_v37 = vrot.slane %v312_v31, %v974_v38  ;;  %v412_v40 = vsub.s32 %v983_v42, %v405_v29  ;;  %v436_v41 = vrot.slane %v426_v32, %v974_v38  ;;  %v453_v43 = vrot.slane %v312_v31, %v977_v39 }
  0x5b   : > { %496 = vmatpush1.bf16.msra.mxu0 %v480_v11  ;;  %801 = vmatpush1.bf16.msra.mxu1 %v480_v11  ;;  %vm418_vm6 = vcmp.eq.s32.totalorder %v410_v33, 1  ;;  %v440_v45 = vrot.slane %v430_v35, %v974_v38  ;;  %vm414_vm9 = vcmp.eq.s32.totalorder %v410_v33, 0  ;;  %vm658_vm0 = vcmask 1042434  }
  0x5c   : > { %v459_v46 = vrot.slane %v449_v37, %v974_v38  ;;  %vm420_vm8 = vcmp.eq.s32.totalorder %v412_v40, 1  ;;  %v441_v47 = vsel %vm418_vm6, %v436_v41, 0.0  ;;  %vm416_vm12 = vcmp.eq.s32.totalorder %v412_v40, 0 }
  0x5d   : > { %v443_v49 = vsel %vm420_vm8, %v436_v41, 0.0  ;;  %vm660_vm1 = vcmask 1046534   ;;  %vm663_vm2 = vcmask 1043459   ;;  %vm665_vm3 = vcmask 1047559  }
  0x5e   : > { %792 = vmatmul.mubr.msk.bf16.vlgmr.msra.gmra.mrb[0].mxu0 %vm482_vm15, %v476_v12  ;;  %794 = vmatmul.mubr.msk.bf16.vlgmr.msra.gmra.mrb[0].mxu1 %vm482_vm15, %v478_v13  ;;  %v464_v50 = vsel %vm414_vm9, %v459_v46, %v441_v47  ;;  %v466_v53 = vsel %vm416_vm12, %v459_v46, %v443_v49 }
  0x5f   : > { %537 = vmatprep.mubr.bf16.mxu0 %v888_v0  ;;  %557 = vmatprep.mubr.bf16.mxu1 %v888_v0  ;;  %v401_v0 = vrot.slane %v805_v24, %v977_v39 }
  0x61   : > { %v409_v30 = vrot.slane %v401_v0, %v974_v38 }
  0x63   : > { %v411_v36 = vsub.s32 %v970_v34, %v409_v30  ;;  %v413_v44 = vsub.s32 %v983_v42, %v409_v30  ;;  %v463_v34 = vrot.slane %v453_v43, %v974_v38 }
  0x65   : > { %vm419_vm7 = vcmp.eq.s32.totalorder %v411_v36, 1  ;;  %vm421_vm10 = vcmp.eq.s32.totalorder %v413_v44, 1  ;;  %vm415_vm11 = vcmp.eq.s32.totalorder %v411_v36, 0  ;;  %vm417_vm13 = vcmp.eq.s32.totalorder %v413_v44, 0 }
  0x66   : > { %793 = vmatmul.mubr.msk.bf16.gmra.mrb[4].mxu0 %vm482_vm15, %v477_v18  ;;  %795 = vmatmul.mubr.msk.bf16.gmra.mrb[4].mxu1 %vm482_vm15, %v479_v19  ;;  %v442_v48 = vsel %vm419_vm7, %v440_v45, 0.0  ;;  %v444_v39 = vsel %vm421_vm10, %v440_v45, 0.0  ;;  %vm655_vm15 = vcmask 1045509  }
  0x67   : > { %v465_v42 = vsel %vm415_vm11, %v463_v34, %v442_v48  ;;  %v467_v58 = vsel %vm417_vm13, %v463_v34, %v444_v39 }
 0x131   : > { %v529_v51 = vpop.f32.mrb[0].mxu0  ;;  %v549_v52 = vpop.f32.mrb[0].mxu1 }
 0x132   : > { %v568_v54 = vmul.f32 %v529_v51, %v464_v50  ;;  %v576_v55 = vmul.f32 %v549_v52, %v464_v50  ;;  %v531_v56 = vpop.f32.mrb[1].mxu0  ;;  %v551_v57 = vpop.f32.mrb[1].mxu1 }
 0x133   : > { %v569_v59 = vmul.f32 %v531_v56, %v465_v42  ;;  %v577_v60 = vmul.f32 %v551_v57, %v465_v42  ;;  %v533_v38 = vpop.f32.mrb[2].mxu0  ;;  %v553_v61 = vpop.f32.mrb[2].mxu1 }
 0x134   : > { %v570_v62 = vmul.f32 %v533_v38, %v466_v53  ;;  %v578_v63 = vmul.f32 %v553_v61, %v466_v53  ;;  %v535_v1 = vpop.f32.mrb[3].mxu0  ;;  %v555_v2 = vpop.f32.mrb[3].mxu1 }
 0x135   : > { %v571_v3 = vmul.f32 %v535_v1, %v467_v58  ;;  %v579_v4 = vmul.f32 %v555_v2, %v467_v58 }
 0x136   : > { %v584_v5 = vadd.f32 %v570_v62, %v568_v54  ;;  %v612_v6 = vadd.f32 %v578_v63, %v576_v55 }
 0x137   : > { %v591_v7 = vadd.f32 %v571_v3, %v569_v59  ;;  %v619_v8 = vadd.f32 %v579_v4, %v577_v60 }
 0x138   : > { %v585_v9 = vrot.slane %v584_v5, 4  ;;  %v613_v10 = vrot.slane %v612_v6, 4 }
 0x139   : > { %v592_v11 = vrot.slane %v591_v7, 4  ;;  %v620_v12 = vrot.slane %v619_v8, 4  ;;  %v539_v13 = vpop.f32.mrb[4].mxu0  ;;  %v559_v14 = vpop.f32.mrb[4].mxu1 }
 0x13a   : > { %v586_v15 = vadd.f32 %v585_v9, %v584_v5  ;;  %v614_v16 = vadd.f32 %v613_v10, %v612_v6  ;;  %v572_v17 = vmul.f32 %v539_v13, %v464_v50  ;;  %v580_v18 = vmul.f32 %v559_v14, %v464_v50  ;;  %v541_v19 = vpop.f32.mrb[5].mxu0  ;;  %v561_v20 = vpop.f32.mrb[5].mxu1 }
 0x13b   : > { %v593_v21 = vadd.f32 %v592_v11, %v591_v7  ;;  %v621_v22 = vadd.f32 %v620_v12, %v619_v8  ;;  %v573_v23 = vmul.f32 %v541_v19, %v465_v42  ;;  %v581_v24 = vmul.f32 %v561_v20, %v465_v42  ;;  %v543_v25 = vpop.f32.mrb[6].mxu0  ;;  %v563_v26 = vpop.f32.mrb[6].mxu1 }
 0x13c   : > { %v587_v0 = vrot.slane %v586_v15, 2  ;;  %v615_v27 = vrot.slane %v614_v16, 2  ;;  %v574_v28 = vmul.f32 %v543_v25, %v466_v53  ;;  %v582_v29 = vmul.f32 %v563_v26, %v466_v53  ;;  %v545_v30 = vpop.f32.mrb[7].mxu0  ;;  %v565_v31 = vpop.f32.mrb[7].mxu1 }
 0x13d   : > { %v594_v32 = vrot.slane %v593_v21, 2  ;;  %v622_v33 = vrot.slane %v621_v22, 2  ;;  %v575_v35 = vmul.f32 %v545_v30, %v467_v58  ;;  %v583_v36 = vmul.f32 %v565_v31, %v467_v58 }
 0x13e   : > { %v588_v37 = vadd.f32 %v587_v0, %v586_v15  ;;  %v616_v40 = vadd.f32 %v615_v27, %v614_v16  ;;  %v598_v41 = vadd.f32 %v574_v28, %v572_v17  ;;  %v626_v43 = vadd.f32 %v582_v29, %v580_v18 }
 0x13f   : > { %v595_v44 = vadd.f32 %v594_v32, %v593_v21  ;;  %v623_v45 = vadd.f32 %v622_v33, %v621_v22  ;;  %v605_v46 = vadd.f32 %v575_v35, %v573_v23  ;;  %v633_v47 = vadd.f32 %v583_v36, %v581_v24 }
 0x140   : > { %v589_v34 = vrot.slane %v588_v37, 1  ;;  %v617_v48 = vrot.slane %v616_v40, 1  ;;  %v599_v49 = vrot.slane %v598_v41, 4  ;;  %v627_v50 = vrot.slane %v626_v43, 4 }
 0x141   : > { %v596_v39 = vrot.slane %v595_v44, 1  ;;  %v624_v42 = vrot.slane %v623_v45, 1  ;;  %v606_v51 = vrot.slane %v605_v46, 4  ;;  %v634_v52 = vrot.slane %v633_v47, 4 }
 0x142   : > { %v590_v53 = vadd.f32 %v589_v34, %v588_v37  ;;  %v618_v54 = vadd.f32 %v617_v48, %v616_v40  ;;  %v600_v55 = vadd.f32 %v599_v49, %v598_v41  ;;  %v628_v56 = vadd.f32 %v627_v50, %v626_v43 }
 0x143   : > { %v597_v57 = vadd.f32 %v596_v39, %v595_v44  ;;  %v625_v58 = vadd.f32 %v624_v42, %v623_v45  ;;  %v607_v59 = vadd.f32 %v606_v51, %v605_v46  ;;  %v635_v60 = vadd.f32 %v634_v52, %v633_v47 }
 0x144   : > { %v601_v38 = vrot.slane %v600_v55, 2  ;;  %v629_v61 = vrot.slane %v628_v56, 2 }
 0x145   : > { %v648_v62 = vcombine.low %v590_v53, %v597_v57  ;;  %v650_v63 = vcombine.low %v618_v54, %v625_v58  ;;  %v608_v1 = vrot.slane %v607_v59, 2  ;;  %v636_v2 = vrot.slane %v635_v60, 2 }
 0x146   : > { %v602_v3 = vadd.f32 %v601_v38, %v600_v55  ;;  %v630_v4 = vadd.f32 %v629_v61, %v628_v56 }
 0x147   : > { %v609_v5 = vadd.f32 %v608_v1, %v607_v59  ;;  %v637_v6 = vadd.f32 %v636_v2, %v635_v60  ;;  %v657_v18 = vrot.slane %v650_v63, 6 }
 0x148   : > { %v603_v7 = vrot.slane %v602_v3, 1  ;;  %v631_v8 = vrot.slane %v630_v4, 1 }
 0x149   : > { %v610_v9 = vrot.slane %v609_v5, 1  ;;  %v638_v10 = vrot.slane %v637_v6, 1 }
 0x14a   : > { %v604_v11 = vadd.f32 %v603_v7, %v602_v3  ;;  %v632_v12 = vadd.f32 %v631_v8, %v630_v4 }
 0x14b   : > { %v611_v13 = vadd.f32 %v610_v9, %v609_v5  ;;  %v639_v14 = vadd.f32 %v638_v10, %v637_v6 }
 0x14d   : > { %v649_v15 = vcombine.low %v604_v11, %v611_v13  ;;  %v651_v16 = vcombine.low %v632_v12, %v639_v14 }
 0x14f   : > { %v652_v17 = vrot.slane %v649_v15, 7  ;;  %v662_v22 = vrot.slane %v651_v16, 5 }
 0x151   : > { %v654_v19 = vsel %vm653_vm14, %v652_v17, %v648_v62 }
 0x152   : > { %v656_v20 = vsel %vm655_vm15, %v652_v17, %v654_v19 }
 0x153   : > { %v659_v21 = vsel %vm658_vm0, %v657_v18, %v656_v20 }
 0x154   : > { %v661_v23 = vsel %vm660_vm1, %v657_v18, %v659_v21 }
 0x155   : > { %v664_v24 = vsel %vm663_vm2, %v662_v22, %v661_v23 }
 0x156   : > { %v666_v25 = vsel %vm665_vm3, %v662_v22, %v664_v24 }
 0x157   : > { %668 = vst [vmem:[%s228_s28] sm:$0xff] %v666_v25 }
 0x158 PF: > { %s14_s14 = sadd.s32 1, %s885_s14   ;;  %s1053_s12 = smov %s881_s13 }
 0x159   : > { %p11_p2 = scmp.ge.s32.totalorder %s14_s14, 4   ;;  %s1054_s13 = smov %s1056_s16 }
 0x15b   :  { %13 = sbr.rel (!%p11_p2) target bundleno = 2 (0x2), region = 70 }
 0x162   :  { %699 = vsyncpa [#allocation3], 1 }
 0x163   :  { %701 = vsyncpa [#allocation3 + $0x1], 1 }

</bundles_post_ra>
